<compile_context>
chip_gen: v6e
topology: v6e:2x2x1
jax: 0.10.0
libtpu: 0.0.40
codegen_flags: <defaults>
</compile_context>

<pallas_src>
import numpy as np

import jax
import jax.numpy as jnp
from jax.experimental import pallas as pl
from jax.experimental.pallas import tpu as pltpu


# ---------------------------------------------------------------------------
# Pass 1 kernels: polyphase deconv matmul + per-tile partial BN statistics
# ---------------------------------------------------------------------------
def _deconv_stats_kernel(x_ref, w_ref, st_ref):
    # x_ref : (1, 1, KC, TL)        phase-major im2col tile (lane axis = phase positions)
    # w_ref : (1, 2, C_out, KC)     folded per-phase weights, split into GLU halves
    # st_ref: (1, 2, 2, C_out)      per-tile [half][sum, sumsq][channel] (lane-major channels)
    x2 = x_ref[0, 0]
    z_a = jnp.dot(w_ref[0, 0], x2, preferred_element_type=jnp.float32)   # (C_out, TL)
    z_g = jnp.dot(w_ref[0, 1], x2, preferred_element_type=jnp.float32)
    st_ref[0, 0] = jnp.stack([jnp.sum(z_a, axis=1), jnp.sum(z_a * z_a, axis=1)], axis=0)
    st_ref[0, 1] = jnp.stack([jnp.sum(z_g, axis=1), jnp.sum(z_g * z_g, axis=1)], axis=0)


def _deconv_stats_z_kernel(x_ref, w_ref, st_ref, z_ref):
    # Same as above but also materializes z (already split into GLU halves, lane-dense).
    x2 = x_ref[0, 0]
    z_a = jnp.dot(w_ref[0, 0], x2, preferred_element_type=jnp.float32)
    z_g = jnp.dot(w_ref[0, 1], x2, preferred_element_type=jnp.float32)
    z_ref[0, 0] = z_a.astype(z_ref.dtype)
    z_ref[0, 1] = z_g.astype(z_ref.dtype)
    st_ref[0, 0] = jnp.stack([jnp.sum(z_a, axis=1), jnp.sum(z_a * z_a, axis=1)], axis=0)
    st_ref[0, 1] = jnp.stack([jnp.sum(z_g, axis=1), jnp.sum(z_g * z_g, axis=1)], axis=0)


# ---------------------------------------------------------------------------
# Pass 2 kernels: folded BatchNorm scale/shift + GLU (halves arrive pre-split)
# ---------------------------------------------------------------------------
def _bn_glu_from_z_kernel(z_ref, sc_ref, sh_ref, o_ref):
    a = z_ref[0, 0].astype(jnp.float32) * sc_ref[0] + sh_ref[0]
    g = z_ref[0, 1].astype(jnp.float32) * sc_ref[1] + sh_ref[1]
    o_ref[0, 0] = (a * jax.nn.sigmoid(g)).astype(o_ref.dtype)


def _bn_glu_recompute_kernel(x_ref, w_ref, sc_ref, sh_ref, o_ref):
    # Re-reads the (cheap) bf16 im2col and recomputes z on the MXU instead of a z round trip.
    x2 = x_ref[0, 0]
    z_a = jnp.dot(w_ref[0, 0], x2, preferred_element_type=jnp.float32)
    z_g = jnp.dot(w_ref[0, 1], x2, preferred_element_type=jnp.float32)
    a = z_a * sc_ref[0] + sh_ref[0]
    g = z_g * sc_ref[1] + sh_ref[1]
    o_ref[0, 0] = (a * jax.nn.sigmoid(g)).astype(o_ref.dtype)


# ---------------------------------------------------------------------------
# Helpers
# ---------------------------------------------------------------------------
def _round_up(x, m):
    return (x + m - 1) // m * m


def _cdiv(a, b):
    return -(-a // b)


def _vmem_capacity_bytes(default=64 * 1024 * 1024):
    try:
        info = pltpu.get_tpu_info()
        for name in ("vmem_capacity_bytes", "vmem_bytes", "vmem_size_bytes"):
            v = getattr(info, name, None)
            if v:
                return int(v)
    except Exception:
        pass
    return default


# ---------------------------------------------------------------------------
# Wrapper
# ---------------------------------------------------------------------------
def gated_deconv_bn1d(x, w, b, gamma, beta, *, stride=1, padding=0, output_padding=0,
                      dilation=1, eps=1e-5, compute_dtype=jnp.bfloat16, tl_max=2048):
    """x: (N, C_in, L_in) (PyTorch NCL). w: (C_in, 2*C_out, K). Returns (N, C_out, L_out) f32.

    `b` (deconv bias) is accepted for API parity but intentionally unused: BatchNorm subtracts
    the per-channel batch mean right after the deconv, so the bias cancels exactly in the
    normalized forward output.
    """
    del b  # cancels under BatchNorm (see docstring)

    N, C_in, L_in = x.shape
    C_in_w, C2, K = w.shape                    # ConvTranspose1d weight layout, groups=1
    assert C_in_w == C_in, "groups != 1 unsupported"
    assert C2 % 2 == 0
    C_out = C2 // 2
    s = int(stride)
    L_out = (L_in - 1) * s - 2 * padding + dilation * (K - 1) + output_padding + 1
    assert L_out >= 1

    # ---- polyphase tap decomposition (static Python) -------------------------------------
    # y[c, q*s + r] = sum_{k : (r + padding - k*dilation) % s == 0} sum_ci
    #                   w[ci, c, k] * x[ci, q + (r + padding - k*dilation)//s]
    taps, offs = [], []
    for r in range(s):
        tr, outr = [], []
        for k in range(K):
            num = r + padding - k * dilation
            if num % s == 0:
                tr.append(k)
                outr.append(num // s)
        taps.append(tr)
        offs.append(outr)
    K_eff = max(1, max(len(t) for t in taps))
    KC = K_eff * C_in
    L_ph = _cdiv(L_out, s)                      # phase-major spatial extent

    cb = jnp.dtype(compute_dtype).itemsize
    # Materialize z only when a z round trip is cheaper than re-reading X2 in pass 2.
    materialize_z = (KC * cb) >= 2 * (C2 * cb)

    # ---- tile sizing against a per-generation VMEM budget --------------------------------
    vmem_cap = _vmem_capacity_bytes()
    vmem_limit = min(int(vmem_cap * 0.7), 100 * 1024 * 1024)
    budget = int(vmem_limit * 0.6)
    w_bytes = C2 * KC * cb                      # constant index_map -> fetched once (not 2x)
    stat_blk = 4 * C_out * 4
    sc_bytes = 2 * 2 * C_out * 4

    def per_step_bytes(tl):
        x2_blk = KC * tl * cb
        z_blk = C2 * tl * cb
        out_blk = C_out * tl * 4
        if materialize_z:
            k1 = 2 * x2_blk + w_bytes + 2 * stat_blk + 2 * z_blk
            k2 = 2 * z_blk + sc_bytes + 2 * out_blk
        else:
            k1 = 2 * x2_blk + w_bytes + 2 * stat_blk
            k2 = 2 * x2_blk + w_bytes + sc_bytes + 2 * out_blk
        return max(k1, k2)

    TL = max(128, min(_round_up(L_ph, 128), _round_up(max(int(tl_max), 128), 128)))
    while TL > 128 and per_step_bytes(TL) > budget:
        TL -= 128
    T_l = _cdiv(L_ph, TL)
    if N * s * T_l < 2 and L_ph > 128:          # give v7x megacore at least 2 grid steps
        TL = _round_up(_cdiv(L_ph, 2), 128)
        T_l = _cdiv(L_ph, TL)
    L_w = T_l * TL

    # ---- glue: phase-major im2col, built directly in compute_dtype (typically bf16) ------
    x_c = x.astype(compute_dtype)
    w_c = w.astype(compute_dtype)

    all_offs = [o for po in offs for o in po] or [0]
    pad_l = max(0, -min(all_offs))
    pad_r = max(0, max(all_offs) + L_w - L_in)
    xp = jnp.pad(x_c, ((0, 0), (0, 0), (pad_l, pad_r)))
    zero_slab = jnp.zeros((N, C_in, L_w), compute_dtype)

    phase_rows = []
    for r in range(s):
        slots = []
        for j in range(K_eff):
            if j < len(taps[r]):
                st = offs[r][j] + pad_l
                slots.append(xp[:, :, st:st + L_w])
            else:
                slots.append(zero_slab)
        phase_rows.append(jnp.stack(slots, axis=1))             # (N, K_eff, C_in, L_w)
    X2 = jnp.stack(phase_rows, axis=1).reshape(N, s, KC, L_w)   # row index = j*C_in + ci

    # Mask output positions >= L_out so BN statistics stay exact (count = N * L_out).
    q = np.arange(L_w)
    out_valid = (q[None, :] * s + np.arange(s)[:, None]) < L_out        # (s, L_w), static
    X2 = jnp.where(jnp.asarray(out_valid)[None, :, None, :], X2,
                   jnp.zeros((), compute_dtype))

    # Folded, GLU-half-split weights: W_split[r, h, c, j*C_in+ci] = w[ci, h*C_out+c, taps[r][j]]
    w_phases = []
    for r in range(s):
        cols = []
        for j in range(K_eff):
            if j < len(taps[r]):
                cols.append(jnp.transpose(w_c[:, :, taps[r][j]], (1, 0)))   # (C2, C_in)
            else:
                cols.append(jnp.zeros((C2, C_in), compute_dtype))
        w_phases.append(jnp.concatenate(cols, axis=1))                      # (C2, KC)
    W_split = jnp.stack(w_phases, axis=0).reshape(s, 2, C_out, KC)

    cp = pltpu.CompilerParams(
        dimension_semantics=("parallel", "parallel", "parallel"),
        vmem_limit_bytes=vmem_limit)

    x2_spec = pl.BlockSpec((1, 1, KC, TL), lambda n, r, t: (n, r, 0, t))
    w_spec = pl.BlockSpec((1, 2, C_out, KC), lambda n, r, t: (r, 0, 0, 0))
    st_shape = jax.ShapeDtypeStruct((N * s * T_l, 2, 2, C_out), jnp.float32)
    st_spec = pl.BlockSpec((1, 2, 2, C_out),
                           lambda n, r, t: ((n * s + r) * T_l + t, 0, 0, 0))

    # ---- pass 1: polyphase deconv matmul + per-tile partial BN statistics ----------------
    if materialize_z:
        stats, z_all = pl.pallas_call(
            _deconv_stats_z_kernel,
            out_shape=(st_shape,
                       jax.ShapeDtypeStruct((N * s, 2, C_out, L_w), compute_dtype)),
            grid_spec=pltpu.PrefetchScalarGridSpec(
                num_scalar_prefetch=0, grid=(N, s, T_l),
                in_specs=[x2_spec, w_spec],
                out_specs=[st_spec,
                           pl.BlockSpec((1, 2, C_out, TL),
                                        lambda n, r, t: (n * s + r, 0, 0, t))]),
            compiler_params=cp,
        )(X2, W_split)
    else:
        stats = pl.pallas_call(
            _deconv_stats_kernel,
            out_shape=st_shape,
            grid_spec=pltpu.PrefetchScalarGridSpec(
                num_scalar_prefetch=0, grid=(N, s, T_l),
                in_specs=[x2_spec, w_spec],
                out_specs=st_spec),
            compiler_params=cp,
        )(X2, W_split)
        z_all = None

    # ---- glue: combine partial stats, fold BN(train) into per-channel scale/shift --------
    S = jnp.sum(stats, axis=0)                              # (2, 2, C_out): [half][sum,sumsq][c]
    count = jnp.float32(N * L_out)
    mean = S[:, 0, :] / count
    var = jnp.maximum(S[:, 1, :] / count - mean * mean, 0.0)   # biased var (PyTorch train fwd)
    scale = gamma.astype(jnp.float32).reshape(2, C_out) * jax.lax.rsqrt(var + eps)
    shift = beta.astype(jnp.float32).reshape(2, C_out) - mean * scale
    sc = scale[:, :, None]                                  # (2, C_out, 1)
    sh = shift[:, :, None]

    sc_spec = pl.BlockSpec((2, C_out, 1), lambda n, r, t: (0, 0, 0))
    out_shape = jax.ShapeDtypeStruct((N, s, C_out, L_ph), jnp.float32)
    out_spec = pl.BlockSpec((1, 1, C_out, TL), lambda n, r, t: (n, r, 0, t))

    # ---- pass 2: BN + GLU, phase-major lane-dense output (partial trailing block, no crop) -
    if materialize_z:
        out_ph = pl.pallas_call(
            _bn_glu_from_z_kernel,
            out_shape=out_shape,
            grid_spec=pltpu.PrefetchScalarGridSpec(
                num_scalar_prefetch=0, grid=(N, s, T_l),
                in_specs=[pl.BlockSpec((1, 2, C_out, TL),
                                       lambda n, r, t: (n * s + r, 0, 0, t)),
                          sc_spec, sc_spec],
                out_specs=out_spec),
            compiler_params=cp,
        )(z_all, sc, sh)
    else:
        out_ph = pl.pallas_call(
            _bn_glu_recompute_kernel,
            out_shape=out_shape,
            grid_spec=pltpu.PrefetchScalarGridSpec(
                num_scalar_prefetch=0, grid=(N, s, T_l),
                in_specs=[x2_spec, w_spec, sc_spec, sc_spec],
                out_specs=out_spec),
            compiler_params=cp,
        )(X2, W_split, sc, sh)

    # ---- phase interleave (stride == 1 needs nothing; otherwise one reshape/transpose) ----
    if s == 1:
        return out_ph[:, 0]                                 # (N, C_out, L_out), no copy pass
    out = jnp.transpose(out_ph, (0, 2, 3, 1)).reshape(N, C_out, L_ph * s)
    return out[:, :, :L_out]


# ---------------------------------------------------------------------------
# Pure-JAX reference (direct ConvTranspose1d scatter + BN(train) + GLU), bias included
# ---------------------------------------------------------------------------
def reference(x, w, b, gamma, beta, *, stride, padding, output_padding, dilation=1, eps=1e-5):
    N, C_in, L_in = x.shape
    _, C2, K = w.shape
    L_out = (L_in - 1) * stride - 2 * padding + dilation * (K - 1) + output_padding + 1
    L_full = (L_in - 1) * stride + dilation * (K - 1) + 1 + output_padding
    ypad = jnp.zeros((N, C2, L_full), jnp.float32)
    for k in range(K):
        contrib = jnp.einsum("ncl,cd->ndl", x, w[:, :, k])                    # (N, C2, L_in)
        lo = k * dilation
        ypad = ypad.at[:, :, lo:lo + (L_in - 1) * stride + 1:stride].add(contrib)
    y = ypad[:, :, padding:padding + L_out] + b[None, :, None]
    mean = y.mean(axis=(0, 2))
    var = y.var(axis=(0, 2))          # biased variance (used for normalization in training)
    yn = (y - mean[None, :, None]) / jnp.sqrt(var[None, :, None] + eps)
    yn = yn * gamma[None, :, None] + beta[None, :, None]
    a, g = yn[:, :C2 // 2], yn[:, C2 // 2:]
    return a * jax.nn.sigmoid(g)


if __name__ == "__main__":
    def run_case(name, *, N, C_in, L_in, out_channels, K, stride, padding, output_padding,
                 dilation, compute_dtype, atol, rtol, key):
        C2 = 2 * out_channels
        kx, kw, kb, kg, kbt = jax.random.split(key, 5)
        x = jax.random.normal(kx, (N, C_in, L_in), jnp.float32)
        w = 0.3 * jax.random.normal(kw, (C_in, C2, K), jnp.float32)
        b = 0.1 * jax.random.normal(kb, (C2,), jnp.float32)
        gamma = 1.0 + 0.1 * jax.random.normal(kg, (C2,), jnp.float32)
        beta = 0.1 * jax.random.normal(kbt, (C2,), jnp.float32)

        out = gated_deconv_bn1d(x, w, b, gamma, beta, stride=stride, padding=padding,
                                output_padding=output_padding, dilation=dilation,
                                compute_dtype=compute_dtype)
        out = jax.block_until_ready(out)
        ref = reference(x, w, b, gamma, beta, stride=stride, padding=padding,
                        output_padding=output_padding, dilation=dilation)
        L_out = (L_in - 1) * stride - 2 * padding + dilation * (K - 1) + output_padding + 1
        assert out.shape == (N, out_channels, L_out), (name, out.shape)
        err = float(jnp.max(jnp.abs(out - ref)))
        assert jnp.allclose(out, ref, atol=atol, rtol=rtol), (name, err)

    key = jax.random.PRNGKey(0)
    k1, k2, k3, k4 = jax.random.split(key, 4)

    # strided polyphase, f32 compute path (validates the polyphase math exactly)
    run_case("poly_f32", N=2, C_in=4, L_in=16, out_channels=4, K=4, stride=2, padding=1,
             output_padding=1, dilation=1, compute_dtype=jnp.float32,
             atol=2e-4, rtol=2e-4, key=k1)

    # strided + dilated polyphase, default bf16 MXU path (z-recompute branch)
    run_case("poly_bf16", N=2, C_in=8, L_in=60, out_channels=8, K=4, stride=3, padding=3,
             output_padding=1, dilation=2, compute_dtype=jnp.bfloat16,
             atol=1e-1, rtol=1e-1, key=k2)

    # stride=1, wide contraction -> materialized-z branch, partial trailing output block
    run_case("mat_z_f32", N=2, C_in=16, L_in=40, out_channels=4, K=5, stride=1, padding=2,
             output_padding=0, dilation=1, compute_dtype=jnp.float32,
             atol=2e-4, rtol=2e-4, key=k3)

    # same materialized-z branch with bf16 streams
    run_case("mat_z_bf16", N=2, C_in=16, L_in=40, out_channels=4, K=5, stride=1, padding=2,
             output_padding=0, dilation=1, compute_dtype=jnp.bfloat16,
             atol=1e-1, rtol=1e-1, key=k4)

    print("KERNEL_OK")
</pallas_src>

<mosaic_0001>
module attributes {stable_mosaic.version = 11 : i64} {
  func.func @_deconv_stats_kernel(%arg0: i32, %arg1: i32, %arg2: i32, %arg3: memref<1x1x8x128xf32, #tpu.memory_space<vmem>>, %arg4: memref<1x2x4x8xf32, #tpu.memory_space<vmem>>, %arg5: memref<1x2x2x4xf32, #tpu.memory_space<vmem>>) attributes {dimension_semantics = [#tpu.dimension_semantics<parallel>, #tpu.dimension_semantics<parallel>, #tpu.dimension_semantics<parallel>], iteration_bounds = array<i64: 2, 2, 1>, scalar_prefetch = 0 : i64, scratch_operands = 0 : i64, tpu.core_type = #tpu.core_type<tc>, window_params = [{transform_indices = @transform_0, window_bounds = array<i64: 1, 1, 8, 128>}, {transform_indices = @transform_1, window_bounds = array<i64: 1, 2, 4, 8>}, {transform_indices = @transform_2, window_bounds = array<i64: 1, 2, 2, 4>}]} {
    %c0 = arith.constant 0 : index
    %c0_0 = arith.constant 0 : index
    %c0_1 = arith.constant 0 : index
    %c0_2 = arith.constant 0 : index
    %0 = vector.load %arg3[%c0, %c0_0, %c0_1, %c0_2] : memref<1x1x8x128xf32, #tpu.memory_space<vmem>>, vector<1x1x8x128xf32>
    %1 = vector.shape_cast %0 : vector<1x1x8x128xf32> to vector<8x128xf32>
    %c0_3 = arith.constant 0 : index
    %c0_4 = arith.constant 0 : index
    %c0_5 = arith.constant 0 : index
    %c0_6 = arith.constant 0 : index
    %2 = vector.load %arg4[%c0_3, %c0_4, %c0_5, %c0_6] : memref<1x2x4x8xf32, #tpu.memory_space<vmem>>, vector<1x1x4x8xf32>
    %3 = vector.shape_cast %2 : vector<1x1x4x8xf32> to vector<4x8xf32>
    %cst = arith.constant dense<0.000000e+00> : vector<4x128xf32>
    %4 = tpu.matmul %3, %1, %cst {dimension_numbers = #tpu.dot_dimension_numbers<[1], [0], [0], [1], [0, 0, 1, 1], [], []>} : vector<4x8xf32>, vector<8x128xf32>, vector<4x128xf32> -> vector<4x128xf32>
    %c0_7 = arith.constant 0 : index
    %c1 = arith.constant 1 : index
    %c0_8 = arith.constant 0 : index
    %c0_9 = arith.constant 0 : index
    %5 = vector.load %arg4[%c0_7, %c1, %c0_8, %c0_9] : memref<1x2x4x8xf32, #tpu.memory_space<vmem>>, vector<1x1x4x8xf32>
    %6 = vector.shape_cast %5 : vector<1x1x4x8xf32> to vector<4x8xf32>
    %cst_10 = arith.constant dense<0.000000e+00> : vector<4x128xf32>
    %7 = tpu.matmul %6, %1, %cst_10 {dimension_numbers = #tpu.dot_dimension_numbers<[1], [0], [0], [1], [0, 0, 1, 1], [], []>} : vector<4x8xf32>, vector<8x128xf32>, vector<4x128xf32> -> vector<4x128xf32>
    %cst_11 = arith.constant dense<0.000000e+00> : vector<4xf32>
    %8 = vector.multi_reduction <add>, %4, %cst_11 [1] : vector<4x128xf32> to vector<4xf32>
    %9 = arith.mulf %4, %4 : vector<4x128xf32>
    %cst_12 = arith.constant dense<0.000000e+00> : vector<4xf32>
    %10 = vector.multi_reduction <add>, %9, %cst_12 [1] : vector<4x128xf32> to vector<4xf32>
    %11 = vector.shape_cast %8 : vector<4xf32> to vector<1x4xf32>
    %12 = vector.shape_cast %10 : vector<4xf32> to vector<1x4xf32>
    %13 = tpu.concatenate %11, %12 in 0 : vector<1x4xf32>, vector<1x4xf32> -> vector<2x4xf32>
    %c0_13 = arith.constant 0 : index
    %c0_14 = arith.constant 0 : index
    %c0_15 = arith.constant 0 : index
    %c0_16 = arith.constant 0 : index
    %14 = vector.load %arg5[%c0_13, %c0_14, %c0_15, %c0_16] : memref<1x2x2x4xf32, #tpu.memory_space<vmem>>, vector<1x1x2x4xf32>
    %15 = vector.shape_cast %14 : vector<1x1x2x4xf32> to vector<2x4xf32>
    %16 = vector.shape_cast %13 : vector<2x4xf32> to vector<1x1x2x4xf32>
    tpu.vector_store %arg5[%c0_13, %c0_14, %c0_15, %c0_16], %16 {strides = array<i32>} : memref<1x2x2x4xf32, #tpu.memory_space<vmem>>, vector<1x1x2x4xf32>,
    %cst_17 = arith.constant dense<0.000000e+00> : vector<4xf32>
    %17 = vector.multi_reduction <add>, %7, %cst_17 [1] : vector<4x128xf32> to vector<4xf32>
    %18 = arith.mulf %7, %7 : vector<4x128xf32>
    %cst_18 = arith.constant dense<0.000000e+00> : vector<4xf32>
    %19 = vector.multi_reduction <add>, %18, %cst_18 [1] : vector<4x128xf32> to vector<4xf32>
    %20 = vector.shape_cast %17 : vector<4xf32> to vector<1x4xf32>
    %21 = vector.shape_cast %19 : vector<4xf32> to vector<1x4xf32>
    %22 = tpu.concatenate %20, %21 in 0 : vector<1x4xf32>, vector<1x4xf32> -> vector<2x4xf32>
    %c0_19 = arith.constant 0 : index
    %c1_20 = arith.constant 1 : index
    %c0_21 = arith.constant 0 : index
    %c0_22 = arith.constant 0 : index
    %23 = vector.load %arg5[%c0_19, %c1_20, %c0_21, %c0_22] : memref<1x2x2x4xf32, #tpu.memory_space<vmem>>, vector<1x1x2x4xf32>
    %24 = vector.shape_cast %23 : vector<1x1x2x4xf32> to vector<2x4xf32>
    %25 = vector.shape_cast %22 : vector<2x4xf32> to vector<1x1x2x4xf32>
    tpu.vector_store %arg5[%c0_19, %c1_20, %c0_21, %c0_22], %25 {strides = array<i32>} : memref<1x2x2x4xf32, #tpu.memory_space<vmem>>, vector<1x1x2x4xf32>,
    return
  }
  func.func @transform_0(%arg0: i32, %arg1: i32, %arg2: i32) -> (i32, i32, i32, i32) {
    %c0_i32 = arith.constant 0 : i32
    %c0_i32_0 = arith.constant 0 : i32
    return %arg0, %arg1, %c0_i32, %arg2 : i32, i32, i32, i32
  }
  func.func @transform_1(%arg0: i32, %arg1: i32, %arg2: i32) -> (i32, i32, i32, i32) {
    %c0_i32 = arith.constant 0 : i32
    %c0_i32_0 = arith.constant 0 : i32
    %c0_i32_1 = arith.constant 0 : i32
    %c0_i32_2 = arith.constant 0 : i32
    return %arg1, %c0_i32, %c0_i32_0, %c0_i32_1 : i32, i32, i32, i32
  }
  func.func @transform_2(%arg0: i32, %arg1: i32, %arg2: i32) -> (i32, i32, i32, i32) {
    %c2_i32 = arith.constant 2 : i32
    %0 = arith.muli %arg0, %c2_i32 : i32
    %1 = arith.addi %0, %arg1 : i32
    %c1_i32 = arith.constant 1 : i32
    %2 = arith.muli %1, %c1_i32 : i32
    %3 = arith.addi %2, %arg2 : i32
    %c0_i32 = arith.constant 0 : i32
    %c0_i32_0 = arith.constant 0 : i32
    %c0_i32_1 = arith.constant 0 : i32
    %c0_i32_2 = arith.constant 0 : i32
    return %3, %c0_i32, %c0_i32_0, %c0_i32_1 : i32, i32, i32, i32
  }
}

</mosaic_0001>

<bundles_post_ra>
// kernel: tpu_custom_call.1
= control target key start
LH: loop header
LB: loop body
LE: loop exit
PB: predicated region body
PF: predicated region fallthrough
CT: control target
= control target key end

     0   :  { %s1261_s0 = inlined_call_operand.hbm [shape: f32[2,2,8,128], index: 0, kind: input, shape index: {}]   ;;  %s1262_s1 = inlined_call_operand.hbm [shape: f32[2,2,4,8], index: 1, kind: input, shape index: {}]   ;;  %s1263_s2 = inlined_call_operand.hbm [shape: f32[4,2,2,4], index: 2, kind: output, shape index: {}]  }
   0x1   :  { %1272 = sst [smem:[#allocation17_spill]] %s1261_s0 }
   0x2   :  { %1273 = sst [smem:[#allocation18_spill]] %s1263_s2 }
   0x3   :  { %7 = vsyncpa [#allocation3], 0 }
   0x4   :  { %9 = vsyncpa [#allocation3 + $0x1], 0 }
   0x5   :  { %10 = vsyncpa [#allocation6], 0 }
   0x6   :  { %12 = vsyncpa [#allocation6 + $0x1], 0 }
   0x7   :  { %13 = vsyncpa [#allocation4], 0 }
   0x8   :  { %15 = vsyncpa [#allocation4 + $0x1], 0  ;;  %s975_s9 = smov 0   ;;  %s977_s10 = smov 0  }
   0x9   :  { %s979_s11 = smov 0   ;;  %s981_s12 = smov 0  }
   0xa   :  { %s983_s13 = smov 0   ;;  %s985_s14 = smov 0  }
   0xb   :  { %s987_s15 = smov 0   ;;  %s989_s16 = smov 0  }
   0xc   :  { %s991_s17 = smov 0   ;;  %s993_s18 = smov 0  }
   0xd   :  { %s995_s19 = smov 0   ;;  %s997_s20 = smov 0  }
   0xe   :  { %s999_s21 = smov 0   ;;  %s1001_s22 = smov 0  }
   0xf LB: > { %1274 = sst [smem:[#allocation11_spill]] %s941_s20  ;;  %s1264_s23 = sadd.s32 4294967295, %s949_s22   ;;  %s949_s22 = sphi %s1001_s22, %s21_s22   ;;  %s945_s21 = sphi %s999_s21, %s1303_s21   ;;  %s941_s20 = sphi %s997_s20, %s1302_s20   ;;  %s937_s19 = sphi %s995_s19, %s1314_s19   ;;  %s933_s18 = sphi %s993_s18, %s1300_s18   ;;  %s929_s17 = sphi %s991_s17, %s1313_s17   ;;  %s925_s16 = sphi %s989_s16, %s1312_s16   ;;  %s921_s15 = sphi %s987_s15, %s1311_s15   ;;  %s917_s14 = sphi %s985_s14, %s1310_s14   ;;  %s913_s13 = sphi %s983_s13, %s1309_s13   ;;  %s909_s12 = sphi %s981_s12, %s1308_s12   ;;  %s905_s11 = sphi %s979_s11, %s1307_s11   ;;  %s901_s10 = sphi %s977_s10, %s1306_s10   ;;  %s897_s9 = sphi %s975_s9, %s1305_s9  }
  0x10   : > { %1275 = sst [smem:[#allocation12_spill]] %s945_s21  ;;  %s36_s25 = sadd.s32 1, %s941_s20 }
  0x11   : > { %s40_s26 = sadd.s32 1, %s945_s21  ;;  %p38_p0 = scmp.ge.s32.totalorder %s36_s25, 2 }
  0x12   : > { %s51_s27 = sadd.s32 1, %s929_s17  ;;  %p58_p1 = scmp.ne.s32.totalorder %s929_s17, %s925_s16 }
  0x13   : > { %p59_p2 = scmp.eq.s32.totalorder %s949_s22, 0  ;;  %s1316_s25 = smov (%p38_p0, %s36_s25), 0 }
  0x14   : > { %1276 = sst [smem:[#allocation13_spill]] %s1316_s25  ;;  %s1318_s26 = smov (!%p38_p0, %s40_s26), %s945_s21 }
  0x15   : > { %s45_s28 = ssub.s32 %s941_s20, %s1316_s25  ;;  %p1058_p3 = por %p59_p2, %p58_p1 }
  0x16   : > { %p42_p4 = scmp.ge.s32.totalorder %s1318_s26, 2  ;;  %p64_p5 = scmp.ne.s32.totalorder %s925_s16, %s921_s15 }
  0x17   : > { %p1065_p6 = scmp.eq.s32.totalorder %s1264_s23, 0  ;;  %p75_p7 = scmp.eq.s32.totalorder %s45_s28, 0 }
  0x18   : > { %s1320_s26 = smov (%p42_p4, %s1318_s26), 0  ;;  %s77_s4 = sadd.s32 1, %s917_s14 }
  0x19   : > { %1279 = sst [smem:[#allocation14_spill]] %s1320_s26  ;;  %p1073_p8 = por %p1065_p6, %p64_p5 }
  0x1a   : > { %s44_s5 = ssub.s32 %s945_s21, %s1320_s26  ;;  %p84_p9 = scmp.ne.s32.totalorder %s917_s14, %s913_s13 }
  0x1b   : > { %s46_s6 = sor.u32 %s45_s28, %s44_s5  ;;  %p90_p10 = scmp.ne.s32.totalorder %s913_s13, %s909_s12 }
  0x1c   : > { %p49_p11 = scmp.eq.s32.totalorder %s46_s6, 0  ;;  %p1086_p12 = por %p84_p9, %p59_p2 }
  0x1d   : > { %s1091_s8 = scalar_select %p75_p7, %s917_s14, %s77_s4  }
  0x1e   : > { %s1094_s15 = scalar_select %p49_p11, %s929_s17, %s51_s27  }
  0x1f   : > { %1282 = sst [smem:[#allocation15_spill]] %s1091_s8  ;;  %p1098_p13 = por %p90_p10, %p1065_p6 }
  0x20   : > { %1283 = sst [smem:[#allocation16_spill]] %s1094_s15  ;;  %s568_s12 = sshll.u32 %s945_s21, 1 }
  0x21   : > { %s1284_s24 = scalar_select %p1098_p13, 1, 0 }
  0x22   : > { %s101_s28 = sadd.s32 %s941_s20, %s568_s12  ;;  %s569_s5 = sshll.u32 %s1320_s26, 1 }
  0x23   : > { %s104_s6 = sadd.s32 %s569_s5, %s1316_s25  ;;  %s109_s23 = sadd.s32 1, %s905_s11 }
  0x24   : > { %s106_s2 = ssub.s32 %s101_s28, %s104_s6  ;;  %p119_p0 = scmp.ne.s32.totalorder %s905_s11, %s901_s10 }
  0x25   : > { %p107_p1 = scmp.eq.s32.totalorder %s106_s2, 0  ;;  %s1285_s4 = sadd.s32 4294967295, %s949_s22  }
  0x26   : > { %p120_p2 = scmp.eq.s32.totalorder %s1285_s4, 3  ;;  %p125_p4 = scmp.ne.s32.totalorder %s901_s10, %s897_s9 }
  0x27   : > { %s1286_s27 = sadd.s32 4294967294, %s949_s22   ;;  %p625_p9 = scmp.lt.s32.totalorder %s949_s22, 4 }
  0x28   : > { %p126_p5 = scmp.eq.s32.totalorder %s1286_s27, 3  ;;  %p1118_p6 = por %p120_p2, %p119_p0 }
  0x29   : > { %s1116_s30 = scalar_select %p107_p1, %s905_s11, %s109_s23  }
  0x2a   : > { %s1287_s15 = scalar_select %p1118_p6, 1, 0 }
  0x2b   : > { %p1122_p7 = por %p126_p5, %p125_p4  ;;  %s146_s5 = sand.u32 1, %s929_s17  }
  0x2c   : > { %s574_s2 = sshll.u32 %s101_s28, 7  ;;  %s572_s6 = sshll.u32 %s146_s5, 3 }
  0x2d   : > { %s1288_s12 = scalar_select %p1122_p7, 1, 0 }
  0x2e   : > { %s1289_s0 = sld [smem:[#allocation17_spill]]  ;;  %s150_s21 = scalar_lea.vmem [#allocation2], %s572_s6 }
  0x2f   : > { %s160_s27 = sshll.u32 %s150_s21, 4  ;;  %p1133_p10 = pnand %p625_p9, %p1058_p3  ;;  %s161_s27 = int_to_ptr.vmem [resolvable:$true] %s160_s27 }
  0x30   : > { %p1139_p11 = pnand %p625_p9, %p1086_p12  ;;  %p578_p0 = scmp.ge.s32.totalorder %s949_s22, 1 }
  0x31   : > { %s147_s28 = scalar_lea.sflag [#allocation3], %s146_s5  ;;  %p747_p1 = pneg %p1133_p10 }
  0x32   : > { %s758_s26 = scalar_lea.vmem %s161_s27, 128  ;;  %s951_s21 = smov [#allocation2]  }
  0x33   : > { %p759_p2 = scmp.ne.s32.totalorder %s161_s27, %s758_s26  ;;  %s763_s29 = sshll.u32 %s951_s21, 4  ;;  %s764_s29 = int_to_ptr.vmem [resolvable:$false] %s763_s29 }
  0x34   : > { %s158_s25 = scalar_lea.hbm %s1289_s0, %s574_s2  ;;  %s765_s2 = scalar_lea.vmem %s764_s29, 256 }
  0x35   : > { %p761_p4 = pnand %p759_p2, %p747_p1  ;;  %p766_p3 = scmp.lt.s32.totalorder %s161_s27, %s764_s29 }
  0x36   : > { %p767_p7 = scmp.lt.s32.totalorder %s765_s2, %s758_s26 }
  0x37   : > { %p762_p5 = pneg %p761_p4 }
  0x38   : > { %p768_p6 = por %p767_p7, %p766_p3 }
  0x3a   : > { %p769_p13 = pnand %p768_p6, %p762_p5 }
  0x3c   : > { %772 = shalt.err (!%p769_p13)
}
  0x3d   : > { %617 = dma.hbm_to_vmem [thread:$0]  (!%p1133_p10), %s158_s25, 128, %s161_s27, %s147_s28  }
  0x3e   : > { %p186_p12 = scmp.lt.s32.totalorder %s949_s22, 5  ;;  %s167_s7 = sand.u32 1, %s917_s14  }
  0x3f   : > { %s592_s5 = sshll.u32 %s941_s20, 7  ;;  %s575_s4 = sshll.u32 %s167_s7, 3 }
  0x40   : > { %p1153_p9 = pnand %p578_p0, %p186_p12  ;;  %s177_s29 = scalar_lea.hbm %s1262_s1, %s592_s5 }
  0x41   : > { %s171_s23 = scalar_lea.vmem [#allocation5], %s575_s4  ;;  %s168_s0 = scalar_lea.sflag [#allocation6], %s167_s7 }
  0x42   : > { %s178_s2 = sshll.u32 %s171_s23, 4  ;;  %p775_p13 = pneg %p1139_p11  ;;  %s179_s2 = int_to_ptr.vmem [resolvable:$true] %s178_s2 }
  0x43   : > { %s786_s25 = scalar_lea.vmem %s179_s2, 128  ;;  %s952_s27 = smov [#allocation5]  }
  0x44   : > { %p787_p6 = scmp.ne.s32.totalorder %s179_s2, %s786_s25  ;;  %s791_s28 = sshll.u32 %s952_s27, 4  ;;  %s792_s28 = int_to_ptr.vmem [resolvable:$false] %s791_s28 }
  0x45   : > { %s793_s20 = scalar_lea.vmem %s792_s28, 256  ;;  %p794_p0 = scmp.lt.s32.totalorder %s179_s2, %s792_s28 }
  0x46   : > { %p789_p7 = pnand %p787_p6, %p775_p13  ;;  %p795_p1 = scmp.lt.s32.totalorder %s793_s20, %s786_s25 }
  0x48   : > { %p790_p10 = pneg %p789_p7  ;;  %p796_p2 = por %p795_p1, %p794_p0 }
  0x4a   : > { %p797_p4 = pnand %p796_p2, %p790_p10 }
  0x4c   : > { %800 = shalt.err (!%p797_p4)
}
  0x4d   : > { %s953_s5 = smov 64   ;;  %s954_s4 = smov 4  }
  0x4e   : > { %620 = dma.hbm_to_vmem [thread:$0]  (!%p1139_p11), %s177_s29, 128, %s179_s2, %s168_s0, %s953_s5, %s953_s5, %s954_s4  }
  0x4f   : > { %190 = sbr.rel (%p1153_p9) target bundleno = 446 (0x1be), region = 28  ;;  %s192_s7 = sand.u32 (!%p1153_p9), 1, %s925_s16  }
  0x50   : > { %s579_s26 = sshll.u32 (!%p1153_p9), %s192_s7, 3  ;;  %s193_s21 = scalar_lea.sflag (!%p1153_p9), [#allocation3], %s192_s7 }
  0x51   : > { %s196_s23 = scalar_lea.vmem (!%p1153_p9), [#allocation2], %s579_s26 }
  0x54   : > { %884 = dma.done.wait (%p1073_p8), %s193_s21, 128  }
  0x55   : > { %886 = vsyncadd (%p1073_p8), %s193_s21, 4294967168  ;;  %s201_s20 = sand.u32 1, %s913_s13   ;;  %p1293_p11 = scmp.ne.s32.totalorder %s1284_s24, 0 }
  0x56   : > { %s580_s25 = sshll.u32 %s201_s20, 3  ;;  %s202_s8 = scalar_lea.sflag [#allocation6], %s201_s20 }
  0x57   : > { %s205_s0 = scalar_lea.vmem [#allocation5], %s580_s25 }
  0x58   : > { %888 = dma.done.wait (%p1293_p11), %s202_s8, 128  }
  0x59   : > { %890 = vsyncadd (%p1293_p11), %s202_s8, 4294967168  ;;  %v955_v0 = vmov 0.0   ;;  %vm956_vm0 = vmmov 0   ;;  %vm236_vm1 = vcmask 64512   ;;  %v234_v1 = vld [vmem:[%s196_s23] sm:$0xff]  ;;  %vm385_vm2 = vcmask 1043456  }
  0x5a   : > { %598 = vmatprep.subr.mxu0 %v955_v0  ;;  %603 = vmatprep.subr.mxu1 %v955_v0  ;;  %v235_v2 = vld [vmem:[%s205_s0] sm:$0xf]  ;;  %v583_v3 = vld [vmem:[%s205_s0 + $0x4] sm:$0xf]  ;;  %v394_v14 = vlaneseq  ;;  %s228_s24 = sand.u32 1, %s901_s10   ;;  %s587_s6 = sshll.u32 %s937_s19, 1 }
  0x5b   : > { %600 = vmatprep.mubr.msk.f32.mxu0 %vm956_vm0, %v955_v0  ;;  %605 = vmatprep.mubr.msk.f32.mxu1 %vm956_vm0, %v955_v0  ;;  %s581_s3 = sshll.u32 %s228_s24, 2  ;;  %s442_s29 = sadd.s32 %s933_s18, %s587_s6  ;;  %vm407_vm3 = vcmask 1040384   ;;  %vm409_vm4 = vcmask 25600  }
  0x5c   : > { %599 = vmatpush3.msra.mxu0 %v234_v1  ;;  %604 = vmatpush3.msra.mxu1 %v234_v1  ;;  %v395_v15 = vand.u32 127, %v394_v14  ;;  %v397_v16 = vshrl.u32 %v394_v14, 7  ;;  %s230_s2 = scalar_lea.vmem [#allocation7], %s581_s3  ;;  %s593_s28 = sshll.u32 %s442_s29, 6 }
  0x5d   : > { %601 = vmatmul.mubr.msk.f32.vlgmr.msra.gmra.mxu0 %vm236_vm1, %v235_v2  ;;  %606 = vmatmul.mubr.msk.f32.vlgmr.msra.gmra.mxu1 %vm236_vm1, %v583_v3  ;;  %s450_s27 = sshll.u32 %s230_s2, 4  ;;  %s1294_s4 = sld [smem:[#allocation18_spill]]  ;;  %s1184_s27 = int_to_ptr.vmem [resolvable:$true] %s450_s27 }
  0x5e   : > { %v398_v19 = vsub.s32 %v395_v15, %v397_v16  ;;  %s1186_s18 = scalar_lea.sflag [#allocation4], %s228_s24  ;;  %s801_s26 = scalar_lea.vmem %s1184_s27, 64 }
  0x5f   : > { %p802_p8 = scmp.ne.s32.totalorder %s1184_s27, %s801_s26  ;;  %p1295_p5 = scmp.ne.s32.totalorder %s1287_s15, 0 }
  0x60   : > { %s957_s21 = smov [#allocation7]  }
  0x61   : > { %p803_p3 = pnand %p802_p8, %p1295_p5  ;;  %s805_s23 = sshll.u32 %s957_s21, 4  ;;  %s806_s23 = int_to_ptr.vmem [resolvable:$false] %s805_s23 }
  0x62   : > { %s807_s20 = scalar_lea.vmem %s806_s23, 128  ;;  %p808_p9 = scmp.lt.s32.totalorder %s1184_s27, %s806_s23 }
  0x63   : > { %s1182_s7 = scalar_lea.hbm %s1294_s4, %s593_s28  ;;  %p804_p12 = pneg %p803_p3 }
  0x64   : > { %p809_p13 = scmp.lt.s32.totalorder %s807_s20, %s801_s26 }
  0x66   : > { %p810_p6 = por %p809_p13, %p808_p9 }
  0x68   : > { %p811_p7 = pnand %p810_p6, %p804_p12 }
 0x11d   : > { %v306_v4 = vpop.f32.mrf.mxu0  ;;  %v381_v5 = vpop.f32.mrf.mxu1 }
 0x11e   : > { %v389_v6 = vmul.f32 %v306_v4, %v306_v4  ;;  %v414_v7 = vmul.f32 %v381_v5, %v381_v5  ;;  %v411_v8 = vsel %vm385_vm2, %v381_v5, 0.0  ;;  %v386_v9 = vsel %vm385_vm2, %v306_v4, 0.0 }
 0x11f   : > { %412 = vadd.xlane.f32.xlu1 %v411_v8  ;;  %v607_v10 = vpop.f32.mrf.mxu1  ;;  %387 = vadd.xlane.f32.xlu0 %v386_v9  ;;  %v602_v11 = vpop.f32.mrf.mxu0 }
 0x120   : > { %v415_v12 = vsel %vm385_vm2, %v414_v7, 0.0  ;;  %v390_v13 = vsel %vm385_vm2, %v389_v6, 0.0 }
 0x123   : > { %416 = vadd.xlane.f32.xlu1 %v415_v12  ;;  %391 = vadd.xlane.f32.xlu0 %v390_v13 }
 0x1a8   : > { %v413_v17 = vpop.xlane.xlu1 %412  ;;  %v388_v18 = vpop.xlane.xlu0 %387 }
 0x1a9   : > { %v422_v22 = vrot.slane %v413_v17, %v398_v19  ;;  %v399_v23 = vrot.slane %v388_v18, %v398_v19 }
 0x1ac   : > { %v417_v20 = vpop.xlane.xlu1 %416  ;;  %v392_v21 = vpop.xlane.xlu0 %391 }
 0x1ad   : > { %v428_v24 = vrot.slane %v417_v20, %v398_v19  ;;  %v405_v25 = vrot.slane %v392_v21, %v398_v19 }
 0x1af   : > { %v430_v26 = vsel %vm407_vm3, %v422_v22, %v428_v24  ;;  %v408_v27 = vsel %vm407_vm3, %v399_v23, %v405_v25 }
 0x1b0   : > { %585 = vst.msk [vmem:[%s230_s2 + $0x2] sm:$0x3] %vm409_vm4, %v430_v26  ;;  %410 = vst.msk [vmem:[%s230_s2] sm:$0x3] %vm409_vm4, %v408_v27 }
 0x1b1   : > { %814 = shalt.err (!%p811_p7)
}
 0x1b2   : > { %s815_s25 = scalar_lea.hbm %s1182_s7, 64  ;;  %s819_s24 = scalar_lea.hbm %s1294_s4, 256 }
 0x1b3   : > { %p816_p10 = scmp.ne.s32.totalorder %s1182_s7, %s815_s25  ;;  %p820_p2 = scmp.lt.s32.totalorder %s1182_s7, %s1294_s4 }
 0x1b4   : > { %p821_p4 = scmp.lt.s32.totalorder %s819_s24, %s815_s25 }
 0x1b5   : > { %p817_p0 = pnand %p816_p10, %p1295_p5 }
 0x1b6   : > { %p822_p11 = por %p821_p4, %p820_p2 }
 0x1b7   : > { %p818_p1 = pneg %p817_p0 }
 0x1b9   : > { %p823_p8 = pnand %p822_p11, %p818_p1 }
 0x1bb   : > { %826 = shalt.err (!%p823_p8)
}
 0x1bc   : > { %s958_s29 = smov 32   ;;  %s959_s2 = smov 2  }
 0x1bd   : > { %612 = dma.vmem_to_hbm [thread:$0]  (%p1295_p5), %s1184_s27, 64, %s1182_s7, %s1186_s18, %s958_s29, %s958_s29, %s959_s2  }
 0x1be PF: > { %p626_p3 = scmp.ge.s32.totalorder %s949_s22, 2  ;;  %s465_s28 = sand.u32 1, %s897_s9  }
 0x1bf   : > { %p1296_p12 = scmp.ne.s32.totalorder %s1288_s12, 0  ;;  %s466_s5 = scalar_lea.sflag [#allocation4], %s465_s28 }
 0x1c1   : > { %p622_p9 = pnand %p626_p3, %p1296_p12 }
 0x1c3   : > { %p623_p13 = pneg %p622_p9 }
 0x1c5   : > { %892 = dma.done.wait (%p623_p13), %s466_s5, 64  }
 0x1c6   : > { %894 = vsyncadd (%p623_p13), %s466_s5, 4294967232  ;;  %s21_s22 = sadd.s32 1, %s949_s22   ;;  %s1298_s15 = sld [smem:[#allocation15_spill]] }
 0x1c7   : > { %p1214_p6 = scmp.ge.s32.totalorder %s21_s22, 6   ;;  %s1299_s27 = sld [smem:[#allocation16_spill]] }
 0x1c8   : > { %s1300_s18 = sld [smem:[#allocation11_spill]]  ;;  %s1305_s9 = smov %s901_s10 }
 0x1c9   : > { %s1301_s7 = sld [smem:[#allocation12_spill]]  ;;  %s1306_s10 = smov %s905_s11 }
 0x1ca   : > { %s1302_s20 = sld [smem:[#allocation13_spill]]  ;;  %s1307_s11 = smov %s1116_s30 }
 0x1cb   : > { %s1303_s21 = sld [smem:[#allocation14_spill]]  ;;  %s1308_s12 = smov %s913_s13 }
 0x1cc   : > { %s1309_s13 = smov %s917_s14  ;;  %s1310_s14 = smov %s1298_s15 }
 0x1cd   : > { %s1311_s15 = smov %s925_s16  ;;  %s1312_s16 = smov %s929_s17 }
 0x1ce   : > { %s1313_s17 = smov %s1299_s27  ;;  %20 = sbr.rel (!%p1214_p6) target bundleno = 15 (0xf), region = 88 }
 0x1cf   : > { %s1314_s19 = smov %s1301_s7 }
 0x1d3   :  { %471 = vsyncpa [#allocation3], 1 }
 0x1d4   :  { %473 = vsyncpa [#allocation3 + $0x1], 1 }
 0x1d5   :  { %474 = vsyncpa [#allocation6], 1 }
 0x1d6   :  { %476 = vsyncpa [#allocation6 + $0x1], 1 }
 0x1d7   :  { %477 = vsyncpa [#allocation4], 1 }
 0x1d8   :  { %479 = vsyncpa [#allocation4 + $0x1], 1 }

</bundles_post_ra>
